<compile_context>
chip_gen: v5e
topology: v5e:2x2
jax: 0.10.0
libtpu: 0.0.40
codegen_flags: <defaults>
</compile_context>

<pallas_src>
import numpy as np
import jax
import jax.numpy as jnp
from jax import lax
from jax.experimental import pallas as pl
from jax.experimental.pallas import tpu as pltpu


# ----------------------------------------------------------------------------
# 1-D interpolation taps / matrices (affine_grid + grid_sample math)
# ----------------------------------------------------------------------------
def _interp_taps(size, a_ax, b_ax):
    """Per-output-index 2-tap trilinear weights along one axis
    (align_corners=False, zeros padding)."""
    idx = jnp.arange(size, dtype=jnp.float32)
    base = (2.0 * idx + 1.0) / size - 1.0            # affine_grid base coords
    coord = a_ax * base + b_ax                       # theta applied
    pix = ((coord + 1.0) * size - 1.0) / 2.0         # unnormalize
    i0f = jnp.floor(pix)
    frac = pix - i0f
    i0 = i0f.astype(jnp.int32)
    i1 = i0 + 1
    w0 = jnp.where((i0 >= 0) & (i0 < size), 1.0 - frac, 0.0).astype(jnp.float32)
    w1 = jnp.where((i1 >= 0) & (i1 < size), frac, 0.0).astype(jnp.float32)
    return i0, i1, w0, w1


def _interp_matrix(size, a_ax, b_ax):
    """M[out, in] = trilinear weight of input sample `in` for output `out`."""
    i0, i1, w0, w1 = _interp_taps(size, a_ax, b_ax)
    cols = jnp.arange(size, dtype=jnp.int32)
    M = (jnp.where(cols[None, :] == i0[:, None], w0[:, None], 0.0)
         + jnp.where(cols[None, :] == i1[:, None], w1[:, None], 0.0))
    return M.astype(jnp.float32)


# ----------------------------------------------------------------------------
# Fast path (small H*W): fused kron(MH, MW) spatial stage + MXU depth stage.
# Blocks are (TC, D, H*W) so the output minor dim is lane-dense (>=128).
# ----------------------------------------------------------------------------
def _affine_kron_kernel(x_ref, kt_ref, md_ref, o_ref, t_ref):
    """x_ref/o_ref: (TC, D, HW) VMEM; kt_ref: (HW, HW) = kron(MH, MW)^T VMEM;
    md_ref: (D, D) VMEM; t_ref: (TC, D, HW) f32 VMEM scratch."""
    TC, D, HW = x_ref.shape

    # H/W stage: one (TC*D, HW) @ (HW, HW) MXU matmul -- the kron matrix fuses
    # both per-axis interpolations.  Reshape merges leading dims only (free).
    y = lax.dot_general(
        x_ref[...].reshape(TC * D, HW).astype(jnp.float32), kt_ref[...],
        dimension_numbers=(((1,), (0,)), ((), ())),
        preferred_element_type=jnp.float32)
    t_ref[...] = y.reshape(TC, D, HW)                # stage intermediate in VMEM

    # D stage on the MXU: out[c, e, :] = sum_d MD[e, d] * t[c, d, :]
    md_b = jnp.broadcast_to(md_ref[...], (TC, D, D))     # tiny (D*D per batch)
    out = lax.dot_general(
        md_b, t_ref[...],
        dimension_numbers=(((2,), (1,)), ((0,), (0,))),
        preferred_element_type=jnp.float32)
    o_ref[...] = out.astype(o_ref.dtype)


# ----------------------------------------------------------------------------
# Fallback (large H*W, where kron(MH, MW) would not fit VMEM): separable
# per-axis stages.  Targets volumes where W >= 128 (already lane-dense).
# ----------------------------------------------------------------------------
def _affine_separable_kernel(x_ref, mwt_ref, mh_ref, i0_ref, i1_ref,
                             w0_ref, w1_ref, o_ref, t_ref):
    """x_ref/o_ref: (TC, D, H, W) VMEM; mwt_ref: (W, W) = MW^T VMEM;
    mh_ref: (H, H) VMEM; i0/i1 (D,) int32, w0/w1 (D,) f32 in SMEM;
    t_ref: (TC, D, H, W) f32 VMEM scratch."""
    TC, D, H, W = x_ref.shape

    # W axis: one (TC*D*H, W) @ (W, W') MXU matmul (MW pre-transposed in the
    # wrapper, so the contraction is a plain row-major matmul).
    t = lax.dot_general(
        x_ref[...].reshape(TC * D * H, W).astype(jnp.float32), mwt_ref[...],
        dimension_numbers=(((1,), (0,)), ((), ())),
        preferred_element_type=jnp.float32)

    # H axis: batched MXU matmul over the TC*D depth slices.  (The small-H*W
    # regime where this degenerates into tiny matmuls takes the kron path.)
    t = t.reshape(TC * D, H, W)
    mh_b = jnp.broadcast_to(mh_ref[...], (TC * D, H, H))
    t = lax.dot_general(
        mh_b, t,
        dimension_numbers=(((2,), (1,)), ((0,), (0,))),
        preferred_element_type=jnp.float32)
    t_ref[...] = t.reshape(TC, D, H, W)              # stage intermediate in VMEM

    # D axis: MD has only two non-zeros per row -> 2-tap gather with scalar
    # weights from SMEM, O(1) work per output depth (independent of D).
    # D is an outer (untiled) dim of the scratch, so the dynamic slice is cheap.
    @pl.loop(0, D)
    def _(e):
        lo = t_ref[:, pl.ds(i0_ref[e], 1), :, :]
        hi = t_ref[:, pl.ds(i1_ref[e], 1), :, :]
        o_ref[:, pl.ds(e, 1), :, :] = (
            w0_ref[e] * lo + w1_ref[e] * hi).astype(o_ref.dtype)


# ----------------------------------------------------------------------------
# VMEM budget + tile picking (generation aware)
# ----------------------------------------------------------------------------
def _vmem_capacity_bytes():
    """Physical VMEM of the local TPU (64 MiB on v7x, 128 MiB on v5e/v6e)."""
    try:
        cap = int(pltpu.get_tpu_info().vmem_capacity_bytes)
        if cap > 0:
            return cap
    except Exception:
        pass
    return 64 * 1024 * 1024                          # conservative fallback


def _pick_channel_tile(C, per_channel_elems, itemsize, fixed_bytes, vmem_budget):
    """Largest channel tile TC (divisor of C) whose working set
    (2x input + 2x output double buffers + f32 scratch + resident matrices)
    fits the VMEM budget; back off to >=2 grid steps (>=4 for big tensors)
    so DMA pipelining / megacore sharding has work per step."""
    divisors = [t for t in range(1, C + 1) if C % t == 0]

    def cost(tc):
        blk = tc * per_channel_elems * itemsize
        scratch = tc * per_channel_elems * 4
        return 4 * blk + scratch + fixed_bytes

    fitting = [t for t in divisors if cost(t) <= vmem_budget]
    if not fitting:
        # TODO(synk): tile the D axis (with a 2-tap halo) so single-channel
        # volumes larger than one VMEM block still fit / pipeline.
        return 1
    tc = max(fitting)

    total_bytes = C * per_channel_elems * itemsize
    if C > 1 and total_bytes > (4 << 20):
        want_steps = 4 if total_bytes > (32 << 20) else 2
        smaller = [t for t in fitting if C // t >= want_steps]
        if smaller:
            tc = max(smaller)
    return tc


# ----------------------------------------------------------------------------
# Wrapper
# ----------------------------------------------------------------------------
def affine_transf_forward(xb, a, b, *, force_separable=False):
    """xb: (1, C, D, H, W); a, b: (3,) module params ordered (x/W, y/H, z/D)."""
    N, C, D, H, W = xb.shape
    assert N == 1, "theta has batch size 1, so xb must have N == 1"
    HW = H * W
    itemsize = jnp.dtype(xb.dtype).itemsize

    vmem_limit = int(_vmem_capacity_bytes() * 3) // 4   # headroom below physical

    MW = _interp_matrix(W, a[0], b[0])               # x axis -> W
    MH = _interp_matrix(H, a[1], b[1])               # y axis -> H

    kron_bytes = HW * HW * 4
    use_kron = (not force_separable) and (kron_bytes <= vmem_limit // 8)

    if use_kron:
        # ---- fused H/W stage with one (H*W, H*W) matrix, lane-dense blocks --
        MD = _interp_matrix(D, a[2], b[2])           # z axis -> D
        KT = jnp.kron(MH, MW).T                      # pre-transposed: x2d @ KT
        x = xb.reshape(C, D, HW)

        fixed = 2 * kron_bytes + 2 * D * D * 4
        TC = _pick_channel_tile(C, D * HW, itemsize, fixed, vmem_limit)
        grid = (C // TC,)

        flops = 2 * C * D * HW * HW + 2 * C * D * D * HW
        bytes_accessed = 2 * C * D * HW * itemsize + kron_bytes + D * D * 4

        out = pl.pallas_call(
            _affine_kron_kernel,
            out_shape=jax.ShapeDtypeStruct((C, D, HW), xb.dtype),
            grid=grid,
            in_specs=[
                pl.BlockSpec((TC, D, HW), lambda i: (i, 0, 0)),
                pl.BlockSpec((HW, HW), lambda i: (0, 0)),
                pl.BlockSpec((D, D), lambda i: (0, 0)),
            ],
            out_specs=pl.BlockSpec((TC, D, HW), lambda i: (i, 0, 0)),
            scratch_shapes=[pltpu.VMEM((TC, D, HW), jnp.float32)],
            compiler_params=pltpu.CompilerParams(
                dimension_semantics=("parallel",),
                vmem_limit_bytes=vmem_limit),
            cost_estimate=pl.CostEstimate(flops=int(flops), transcendentals=0,
                                          bytes_accessed=int(bytes_accessed)),
        )(x, KT, MD)
        return out.reshape(N, C, D, H, W)

    # ---- separable fallback (kron matrix too large for VMEM) ---------------
    zi0, zi1, zw0, zw1 = _interp_taps(D, a[2], b[2])
    zi0 = jnp.clip(zi0, 0, D - 1)                    # weights already zero OOB
    zi1 = jnp.clip(zi1, 0, D - 1)
    MWT = MW.T                                       # pre-transposed W-stage matrix
    x = xb.reshape(C, D, H, W)

    fixed = 2 * (W * W + H * H) * 4
    TC = _pick_channel_tile(C, D * H * W, itemsize, fixed, vmem_limit)
    grid = (C // TC,)

    flops = 2 * C * D * H * W * (W + H + 2)
    bytes_accessed = 2 * C * D * H * W * itemsize + (W * W + H * H) * 4

    out = pl.pallas_call(
        _affine_separable_kernel,
        out_shape=jax.ShapeDtypeStruct((C, D, H, W), xb.dtype),
        grid=grid,
        in_specs=[
            pl.BlockSpec((TC, D, H, W), lambda i: (i, 0, 0, 0)),
            pl.BlockSpec((W, W), lambda i: (0, 0)),
            pl.BlockSpec((H, H), lambda i: (0, 0)),
            pl.BlockSpec(memory_space=pltpu.MemorySpace.SMEM),
            pl.BlockSpec(memory_space=pltpu.MemorySpace.SMEM),
            pl.BlockSpec(memory_space=pltpu.MemorySpace.SMEM),
            pl.BlockSpec(memory_space=pltpu.MemorySpace.SMEM),
        ],
        out_specs=pl.BlockSpec((TC, D, H, W), lambda i: (i, 0, 0, 0)),
        scratch_shapes=[pltpu.VMEM((TC, D, H, W), jnp.float32)],
        compiler_params=pltpu.CompilerParams(
            dimension_semantics=("parallel",),
            vmem_limit_bytes=vmem_limit),
        cost_estimate=pl.CostEstimate(flops=int(flops), transcendentals=0,
                                      bytes_accessed=int(bytes_accessed)),
    )(x, MWT, MH, zi0, zi1, zw0, zw1)
    return out.reshape(N, C, D, H, W)


# ----------------------------------------------------------------------------
# Pure-JAX reference (direct trilinear gather, zeros padding) for validation
# ----------------------------------------------------------------------------
def _reference(xb, a, b):
    x = xb[0]                                        # (C, D, H, W)
    C, D, H, W = x.shape

    def pix(size, a_ax, b_ax):
        idx = jnp.arange(size, dtype=jnp.float32)
        base = (2.0 * idx + 1.0) / size - 1.0
        return ((a_ax * base + b_ax + 1.0) * size - 1.0) / 2.0

    def taps(p, size):
        i0 = jnp.floor(p).astype(jnp.int32)
        f = p - i0
        i1 = i0 + 1
        w0 = jnp.where((i0 >= 0) & (i0 < size), 1.0 - f, 0.0)
        w1 = jnp.where((i1 >= 0) & (i1 < size), f, 0.0)
        return (jnp.clip(i0, 0, size - 1), w0), (jnp.clip(i1, 0, size - 1), w1)

    tx = taps(pix(W, a[0], b[0]), W)
    ty = taps(pix(H, a[1], b[1]), H)
    tz = taps(pix(D, a[2], b[2]), D)

    out = jnp.zeros_like(x)
    for zi, wz in tz:
        for yi, wy in ty:
            for xi, wx in tx:
                g = x[:, zi][:, :, yi][:, :, :, xi]
                w = (wz[None, :, None, None]
                     * wy[None, None, :, None]
                     * wx[None, None, None, :])
                out = out + g * w
    return out[None]


if __name__ == "__main__":
    # Deterministic "parameter" initialization (mirrors AffineTransf.__init__):
    #   a = a_init ; b = -2 * b_init / len_per_ax
    a_init = np.array([0.9, 1.1, 1.05], dtype=np.float32)
    b_init = np.array([2.0, -1.0, 0.5], dtype=np.float32)
    len_per_ax = np.array([16.0, 16.0, 8.0], dtype=np.float32)   # (W, H, D)
    a = jnp.asarray(a_init)
    b = jnp.asarray(-2.0 * b_init / len_per_ax)

    # Small 5-D input: N=1 (theta batch is 1), C=4, D=8, H=16, W=16
    key = jax.random.PRNGKey(0)
    xb = jax.random.normal(key, (1, 4, 8, 16, 16), dtype=jnp.float32)

    ref = _reference(xb, a, b)

    # Fast path (kron(MH, MW) fused spatial stage) -- the one the demo size hits.
    out = jax.block_until_ready(affine_transf_forward(xb, a, b))
    np.testing.assert_allclose(np.asarray(out), np.asarray(ref),
                               rtol=1e-4, atol=1e-4)

    # Also exercise the large-H*W separable fallback on the same input.
    out_sep = jax.block_until_ready(
        affine_transf_forward(xb, a, b, force_separable=True))
    np.testing.assert_allclose(np.asarray(out_sep), np.asarray(ref),
                               rtol=1e-4, atol=1e-4)

    print("KERNEL_OK")
</pallas_src>

<mosaic_0001>
module attributes {stable_mosaic.version = 11 : i64} {
  func.func @_affine_kron_kernel(%arg0: i32, %arg1: memref<4x8x256xf32, #tpu.memory_space<vmem>>, %arg2: memref<256x256xf32, #tpu.memory_space<vmem>>, %arg3: memref<8x8xf32, #tpu.memory_space<vmem>>, %arg4: memref<4x8x256xf32, #tpu.memory_space<vmem>>, %arg5: memref<4x8x256xf32, #tpu.memory_space<vmem>>) attributes {dimension_semantics = [#tpu.dimension_semantics<parallel>], iteration_bounds = array<i64: 1>, scalar_prefetch = 0 : i64, scratch_operands = 1 : i64, tpu.core_type = #tpu.core_type<tc>, window_params = [{transform_indices = @transform_0, window_bounds = array<i64: 4, 8, 256>}, {pipeline_mode = #tpu.pipeline_mode<synchronous>, transform_indices = @transform_1, window_bounds = array<i64: 256, 256>}, {pipeline_mode = #tpu.pipeline_mode<synchronous>, transform_indices = @transform_2, window_bounds = array<i64: 8, 8>}, {transform_indices = @transform_3, window_bounds = array<i64: 4, 8, 256>}]} {
    %c0 = arith.constant 0 : index
    %c0_0 = arith.constant 0 : index
    %c0_1 = arith.constant 0 : index
    %0 = vector.load %arg1[%c0, %c0_0, %c0_1] : memref<4x8x256xf32, #tpu.memory_space<vmem>>, vector<4x8x256xf32>
    %1 = vector.shape_cast %0 : vector<4x8x256xf32> to vector<32x256xf32>
    %c0_2 = arith.constant 0 : index
    %c0_3 = arith.constant 0 : index
    %2 = vector.load %arg2[%c0_2, %c0_3] : memref<256x256xf32, #tpu.memory_space<vmem>>, vector<256x256xf32>
    %cst = arith.constant dense<0.000000e+00> : vector<32x256xf32>
    %3 = tpu.matmul %1, %2, %cst {dimension_numbers = #tpu.dot_dimension_numbers<[1], [0], [0], [1], [0, 0, 1, 1], [], []>} : vector<32x256xf32>, vector<256x256xf32>, vector<32x256xf32> -> vector<32x256xf32>
    %4 = vector.shape_cast %3 : vector<32x256xf32> to vector<4x8x256xf32>
    %c0_4 = arith.constant 0 : index
    %c0_5 = arith.constant 0 : index
    %c0_6 = arith.constant 0 : index
    %5 = vector.load %arg5[%c0_4, %c0_5, %c0_6] : memref<4x8x256xf32, #tpu.memory_space<vmem>>, vector<4x8x256xf32>
    tpu.vector_store %arg5[%c0_4, %c0_5, %c0_6], %4 {strides = array<i32>} : memref<4x8x256xf32, #tpu.memory_space<vmem>>, vector<4x8x256xf32>,
    %c0_7 = arith.constant 0 : index
    %c0_8 = arith.constant 0 : index
    %6 = vector.load %arg3[%c0_7, %c0_8] : memref<8x8xf32, #tpu.memory_space<vmem>>, vector<8x8xf32>
    %7 = vector.shape_cast %6 : vector<8x8xf32> to vector<1x8x8xf32>
    %8 = vector.broadcast %7 : vector<1x8x8xf32> to vector<4x8x8xf32>
    %c0_9 = arith.constant 0 : index
    %c0_10 = arith.constant 0 : index
    %c0_11 = arith.constant 0 : index
    %9 = vector.load %arg5[%c0_9, %c0_10, %c0_11] : memref<4x8x256xf32, #tpu.memory_space<vmem>>, vector<4x8x256xf32>
    %cst_12 = arith.constant dense<0.000000e+00> : vector<4x8x256xf32>
    %10 = tpu.matmul %8, %9, %cst_12 {dimension_numbers = #tpu.dot_dimension_numbers<[2], [1], [1], [2], [0, 0, 0, 1, 1, 2], [0], [0]>} : vector<4x8x8xf32>, vector<4x8x256xf32>, vector<4x8x256xf32> -> vector<4x8x256xf32>
    %c0_13 = arith.constant 0 : index
    %c0_14 = arith.constant 0 : index
    %c0_15 = arith.constant 0 : index
    %11 = vector.load %arg4[%c0_13, %c0_14, %c0_15] : memref<4x8x256xf32, #tpu.memory_space<vmem>>, vector<4x8x256xf32>
    tpu.vector_store %arg4[%c0_13, %c0_14, %c0_15], %10 {strides = array<i32>} : memref<4x8x256xf32, #tpu.memory_space<vmem>>, vector<4x8x256xf32>,
    return
  }
  func.func @transform_0(%arg0: i32) -> (i32, i32, i32) {
    %c0_i32 = arith.constant 0 : i32
    %c0_i32_0 = arith.constant 0 : i32
    %c0_i32_1 = arith.constant 0 : i32
    return %arg0, %c0_i32, %c0_i32_0 : i32, i32, i32
  }
  func.func @transform_1(%arg0: i32) -> (i32, i32) {
    %c0_i32 = arith.constant 0 : i32
    %c0_i32_0 = arith.constant 0 : i32
    %c0_i32_1 = arith.constant 0 : i32
    return %c0_i32, %c0_i32_0 : i32, i32
  }
  func.func @transform_2(%arg0: i32) -> (i32, i32) {
    %c0_i32 = arith.constant 0 : i32
    %c0_i32_0 = arith.constant 0 : i32
    %c0_i32_1 = arith.constant 0 : i32
    return %c0_i32, %c0_i32_0 : i32, i32
  }
  func.func @transform_3(%arg0: i32) -> (i32, i32, i32) {
    %c0_i32 = arith.constant 0 : i32
    %c0_i32_0 = arith.constant 0 : i32
    %c0_i32_1 = arith.constant 0 : i32
    return %arg0, %c0_i32, %c0_i32_0 : i32, i32, i32
  }
}

</mosaic_0001>

<bundles_post_ra>
// kernel: tpu_custom_call.1
= control target key start
LH: loop header
LB: loop body
LE: loop exit
PB: predicated region body
PF: predicated region fallthrough
CT: control target
= control target key end

     0   :  { %8 = vsyncpa [#allocation4], 0  ;;  %s628_s0 = inlined_call_operand.hbm [shape: f32[4,8,256], index: 0, kind: input, shape index: {}]   ;;  %s629_s1 = inlined_call_operand.hbm [shape: f32[256,256], index: 1, kind: input, shape index: {}]   ;;  %s630_s2 = inlined_call_operand.hbm [shape: f32[8,8], index: 2, kind: input, shape index: {}]   ;;  %s631_s3 = inlined_call_operand.hbm [shape: f32[4,8,256], index: 3, kind: output, shape index: {}]  }
   0x1   :  { %9 = vsyncpa [#allocation7], 0 }
   0x2   :  { %10 = vsyncpa [#allocation5], 0  ;;  %s28_s14 = sshll.u32 %s629_s1, 4  ;;  %s573_s15 = smov [#allocation6]   ;;  %s29_s14 = int_to_ptr.hbm [resolvable:$true] %s28_s14 }
   0x3   :  { %s30_s16 = sshll.u32 %s573_s15, 4  ;;  %s15_s19 = sshll.u32 %s628_s0, 4  ;;  %s31_s16 = int_to_ptr.vmem [resolvable:$true] %s30_s16  ;;  %s16_s19 = int_to_ptr.hbm [resolvable:$true] %s15_s19 }
   0x4   :  { %s574_s20 = smov 256   ;;  %s575_s21 = smov 16  }
   0x5   :  { %36 = dma.hbm_to_vmem [thread:$0]  %s29_s14, 8192, %s31_s16, [#allocation7], %s574_s20, %s574_s20, %s575_s21  }
   0x6   :  { %s576_s22 = smov [#allocation3]   ;;  %s42_s1 = sshll.u32 %s630_s2, 4  ;;  %s43_s1 = int_to_ptr.hbm [resolvable:$true] %s42_s1 }
   0x7   :  { %s17_s23 = sshll.u32 %s576_s22, 4  ;;  %s577_s0 = smov [#allocation8]   ;;  %s18_s23 = int_to_ptr.vmem [resolvable:$true] %s17_s23 }
   0x8   :  { %23 = dma.hbm_to_vmem [thread:$0]  %s16_s19, 1024, %s18_s23, [#allocation4], %s574_s20, %s574_s20, %s575_s21  }
   0x9   :  { %s44_s26 = sshll.u32 %s577_s0, 4  ;;  %s45_s26 = int_to_ptr.vmem [resolvable:$true] %s44_s26 }
   0xa   :  { %47 = dma.hbm_to_vmem [thread:$0]  %s43_s1, 128, %s45_s26, [#allocation7]  }
   0xb   :  { %567 = dma.done.wait [#allocation4], 1024  }
   0xc   :  { %568 = vsyncadd [#allocation4], 4294966272 }
   0xd   :  { %569 = dma.done.wait [#allocation7], 8320  }
   0xe   :  { %570 = vsyncadd [#allocation7], 4294958976  ;;  %v99_v0 = vld [vmem:[#allocation6 + $0xf8] sm:$0xff]  ;;  %v97_v2 = vld [vmem:[#allocation6 + $0xe8] sm:$0xff]  ;;  %vm265_vm0 = vcmask 64512   ;;  %s578_s2 = smov [#allocation9]  }
   0xf   :  { %v131_v1 = vld [vmem:[#allocation6 + $0x1f8] sm:$0xff]  ;;  %190 = vmatpush.msra.mxu2 %v99_v0  ;;  %v129_v3 = vld [vmem:[#allocation6 + $0x1e8] sm:$0xff]  ;;  %v98_v6 = vld [vmem:[#allocation6 + $0xf0] sm:$0xff]  ;;  %s441_s27 = sshll.u32 %s578_s2, 4  ;;  %s443_s30 = sshll.u32 %s631_s3, 4  ;;  %s442_s27 = int_to_ptr.vmem [resolvable:$true] %s441_s27  ;;  %s444_s30 = int_to_ptr.hbm [resolvable:$true] %s443_s30 }
  0x10   :  { %219 = vmatpush.msra.mxu3 %v131_v1  ;;  %v95_v4 = vld [vmem:[#allocation6 + $0xd8] sm:$0xff]  ;;  %v130_v7 = vld [vmem:[#allocation6 + $0x1f0] sm:$0xff]  ;;  %v96_v8 = vld [vmem:[#allocation6 + $0xe0] sm:$0xff]  ;;  %132 = vmatpush.msra.mxu0 %v98_v6 }
  0x11   :  { %v127_v5 = vld [vmem:[#allocation6 + $0x1d8] sm:$0xff]  ;;  %191 = vmatpush.msra.mxu2 %v97_v2  ;;  %v128_v9 = vld [vmem:[#allocation6 + $0x1e0] sm:$0xff]  ;;  %161 = vmatpush.msra.mxu1 %v130_v7  ;;  %v93_v10 = vld [vmem:[#allocation6 + $0xc8] sm:$0xff] }
  0x12   :  { %220 = vmatpush.msra.mxu3 %v129_v3  ;;  %v125_v11 = vld [vmem:[#allocation6 + $0x1c8] sm:$0xff]  ;;  %v94_v12 = vld [vmem:[#allocation6 + $0xd0] sm:$0xff]  ;;  %133 = vmatpush.msra.mxu0 %v96_v8  ;;  %v91_v14 = vld [vmem:[#allocation6 + $0xb8] sm:$0xff] }
  0x13   :  { %192 = vmatpush.msra.mxu2 %v95_v4  ;;  %v126_v13 = vld [vmem:[#allocation6 + $0x1d0] sm:$0xff]  ;;  %162 = vmatpush.msra.mxu1 %v128_v9  ;;  %v123_v15 = vld [vmem:[#allocation6 + $0x1b8] sm:$0xff]  ;;  %v92_v16 = vld [vmem:[#allocation6 + $0xc0] sm:$0xff] }
  0x14   :  { %221 = vmatpush.msra.mxu3 %v127_v5  ;;  %v124_v17 = vld [vmem:[#allocation6 + $0x1c0] sm:$0xff]  ;;  %134 = vmatpush.msra.mxu0 %v94_v12  ;;  %v89_v18 = vld [vmem:[#allocation6 + $0xa8] sm:$0xff]  ;;  %v90_v20 = vld [vmem:[#allocation6 + $0xb0] sm:$0xff] }
  0x15   :  { %193 = vmatpush.msra.mxu2 %v93_v10  ;;  %163 = vmatpush.msra.mxu1 %v126_v13  ;;  %v121_v19 = vld [vmem:[#allocation6 + $0x1a8] sm:$0xff]  ;;  %v122_v21 = vld [vmem:[#allocation6 + $0x1b0] sm:$0xff]  ;;  %v87_v22 = vld [vmem:[#allocation6 + $0x98] sm:$0xff] }
  0x16   :  { %222 = vmatpush.msra.mxu3 %v125_v11  ;;  %135 = vmatpush.msra.mxu0 %v92_v16  ;;  %v119_v23 = vld [vmem:[#allocation6 + $0x198] sm:$0xff]  ;;  %v88_v24 = vld [vmem:[#allocation6 + $0xa0] sm:$0xff]  ;;  %v85_v26 = vld [vmem:[#allocation6 + $0x88] sm:$0xff] }
  0x17   :  { %194 = vmatpush.msra.mxu2 %v91_v14  ;;  %164 = vmatpush.msra.mxu1 %v124_v17  ;;  %v120_v25 = vld [vmem:[#allocation6 + $0x1a0] sm:$0xff]  ;;  %v117_v27 = vld [vmem:[#allocation6 + $0x188] sm:$0xff]  ;;  %v86_v28 = vld [vmem:[#allocation6 + $0x90] sm:$0xff] }
  0x18   :  { %223 = vmatpush.msra.mxu3 %v123_v15  ;;  %136 = vmatpush.msra.mxu0 %v90_v20  ;;  %v118_v29 = vld [vmem:[#allocation6 + $0x190] sm:$0xff]  ;;  %v83_v30 = vld [vmem:[#allocation6 + $0x78] sm:$0xff]  ;;  %v84_v32 = vld [vmem:[#allocation6 + $0x80] sm:$0xff] }
  0x19   :  { %195 = vmatpush.msra.mxu2 %v89_v18  ;;  %165 = vmatpush.msra.mxu1 %v122_v21  ;;  %v115_v31 = vld [vmem:[#allocation6 + $0x178] sm:$0xff]  ;;  %v116_v33 = vld [vmem:[#allocation6 + $0x180] sm:$0xff]  ;;  %v81_v34 = vld [vmem:[#allocation6 + $0x68] sm:$0xff] }
  0x1a   :  { %224 = vmatpush.msra.mxu3 %v121_v19  ;;  %137 = vmatpush.msra.mxu0 %v88_v24  ;;  %v113_v35 = vld [vmem:[#allocation6 + $0x168] sm:$0xff]  ;;  %v82_v36 = vld [vmem:[#allocation6 + $0x70] sm:$0xff]  ;;  %v79_v38 = vld [vmem:[#allocation6 + $0x58] sm:$0xff] }
  0x1b   :  { %196 = vmatpush.msra.mxu2 %v87_v22  ;;  %166 = vmatpush.msra.mxu1 %v120_v25  ;;  %v114_v37 = vld [vmem:[#allocation6 + $0x170] sm:$0xff]  ;;  %v111_v39 = vld [vmem:[#allocation6 + $0x158] sm:$0xff]  ;;  %v80_v40 = vld [vmem:[#allocation6 + $0x60] sm:$0xff] }
  0x1c   :  { %225 = vmatpush.msra.mxu3 %v119_v23  ;;  %138 = vmatpush.msra.mxu0 %v86_v28  ;;  %v112_v41 = vld [vmem:[#allocation6 + $0x160] sm:$0xff]  ;;  %v77_v42 = vld [vmem:[#allocation6 + $0x48] sm:$0xff]  ;;  %v78_v44 = vld [vmem:[#allocation6 + $0x50] sm:$0xff] }
  0x1d   :  { %197 = vmatpush.msra.mxu2 %v85_v26  ;;  %167 = vmatpush.msra.mxu1 %v118_v29  ;;  %v109_v43 = vld [vmem:[#allocation6 + $0x148] sm:$0xff]  ;;  %v110_v45 = vld [vmem:[#allocation6 + $0x150] sm:$0xff]  ;;  %v75_v46 = vld [vmem:[#allocation6 + $0x38] sm:$0xff] }
  0x1e   :  { %226 = vmatpush.msra.mxu3 %v117_v27  ;;  %139 = vmatpush.msra.mxu0 %v84_v32  ;;  %v107_v47 = vld [vmem:[#allocation6 + $0x138] sm:$0xff]  ;;  %v76_v48 = vld [vmem:[#allocation6 + $0x40] sm:$0xff]  ;;  %v73_v50 = vld [vmem:[#allocation6 + $0x28] sm:$0xff] }
  0x1f   :  { %198 = vmatpush.msra.mxu2 %v83_v30  ;;  %168 = vmatpush.msra.mxu1 %v116_v33  ;;  %v108_v49 = vld [vmem:[#allocation6 + $0x140] sm:$0xff]  ;;  %v105_v51 = vld [vmem:[#allocation6 + $0x128] sm:$0xff]  ;;  %v74_v52 = vld [vmem:[#allocation6 + $0x30] sm:$0xff] }
  0x20   :  { %227 = vmatpush.msra.mxu3 %v115_v31  ;;  %140 = vmatpush.msra.mxu0 %v82_v36  ;;  %v106_v53 = vld [vmem:[#allocation6 + $0x130] sm:$0xff]  ;;  %v71_v54 = vld [vmem:[#allocation6 + $0x18] sm:$0xff]  ;;  %v72_v56 = vld [vmem:[#allocation6 + $0x20] sm:$0xff] }
  0x21   :  { %199 = vmatpush.msra.mxu2 %v81_v34  ;;  %169 = vmatpush.msra.mxu1 %v114_v37  ;;  %v103_v55 = vld [vmem:[#allocation6 + $0x118] sm:$0xff]  ;;  %v104_v57 = vld [vmem:[#allocation6 + $0x120] sm:$0xff]  ;;  %v69_v58 = vld [vmem:[#allocation6 + $0x8] sm:$0xff] }
  0x22   :  { %228 = vmatpush.msra.mxu3 %v113_v35  ;;  %141 = vmatpush.msra.mxu0 %v80_v40  ;;  %v101_v59 = vld [vmem:[#allocation6 + $0x108] sm:$0xff]  ;;  %v60_v60 = vld [vmem:[#allocation3] sm:$0xff]  ;;  %v70_v62 = vld [vmem:[#allocation6 + $0x10] sm:$0xff] }
  0x23   :  { %200 = vmatpush.msra.mxu2 %v79_v38  ;;  %170 = vmatpush.msra.mxu1 %v112_v41  ;;  %v61_v61 = vld [vmem:[#allocation3 + $0x8] sm:$0xff]  ;;  %v102_v63 = vld [vmem:[#allocation6 + $0x110] sm:$0xff]  ;;  %v68_v0 = vld [vmem:[#allocation6] sm:$0xff] }
  0x24   :  { %229 = vmatpush.msra.mxu3 %v111_v39  ;;  %142 = vmatpush.msra.mxu0 %v78_v44  ;;  %v100_v1 = vld [vmem:[#allocation6 + $0x100] sm:$0xff]  ;;  %v62_v2 = vld [vmem:[#allocation3 + $0x10] sm:$0xff]  ;;  %v63_v3 = vld [vmem:[#allocation3 + $0x18] sm:$0xff] }
  0x25   :  { %201 = vmatpush.msra.mxu2 %v77_v42  ;;  %171 = vmatpush.msra.mxu1 %v110_v45  ;;  %v64_v4 = vld [vmem:[#allocation3 + $0x20] sm:$0xff]  ;;  %v65_v5 = vld [vmem:[#allocation3 + $0x28] sm:$0xff]  ;;  %v66_v6 = vld [vmem:[#allocation3 + $0x30] sm:$0xff] }
  0x26   :  { %230 = vmatpush.msra.mxu3 %v109_v43  ;;  %143 = vmatpush.msra.mxu0 %v76_v48  ;;  %v67_v7 = vld [vmem:[#allocation3 + $0x38] sm:$0xff]  ;;  %v256_v14 = vld [vmem:[#allocation8] sm:$0xff] }
  0x27   :  { %202 = vmatpush.msra.mxu2 %v75_v46  ;;  %172 = vmatpush.msra.mxu1 %v108_v49 }
  0x28   :  { %231 = vmatpush.msra.mxu3 %v107_v47  ;;  %144 = vmatpush.msra.mxu0 %v74_v52 }
  0x29   :  { %203 = vmatpush.msra.mxu2 %v73_v50  ;;  %173 = vmatpush.msra.mxu1 %v106_v53 }
  0x2a   :  { %232 = vmatpush.msra.mxu3 %v105_v51  ;;  %145 = vmatpush.msra.mxu0 %v72_v56 }
  0x2b   :  { %204 = vmatpush.msra.mxu2 %v71_v54  ;;  %174 = vmatpush.msra.mxu1 %v104_v57 }
  0x2c   :  { %233 = vmatpush.msra.mxu3 %v103_v55  ;;  %146 = vmatpush.msra.mxu0 %v70_v62 }
  0x2d   :  { %205 = vmatpush.msra.mxu2 %v69_v58  ;;  %175 = vmatpush.msra.mxu1 %v102_v63 }
  0x2e   :  { %234 = vmatpush.msra.mxu3 %v101_v59  ;;  %206 = vmatmul.f32.vlgmr.msra.gmra.mxu2 %v60_v60 }
  0x2f   :  { %235 = vmatmul.f32.vlgmr.msra.gmra.mxu3 %v61_v61  ;;  %147 = vmatpush.msra.mxu0 %v68_v0 }
  0x30   :  { %176 = vmatpush.msra.mxu1 %v100_v1  ;;  %148 = vmatmul.f32.vlgmr.msra.gmra.mxu0 %v60_v60 }
  0x31   :  { %177 = vmatmul.f32.vlgmr.msra.gmra.mxu1 %v61_v61 }
  0x36   :  { %209 = vmatmul.f32.gmra.mxu2 %v62_v2 }
  0x37   :  { %238 = vmatmul.f32.gmra.mxu3 %v63_v3 }
  0x38   :  { %151 = vmatmul.f32.gmra.mxu0 %v62_v2 }
  0x39   :  { %180 = vmatmul.f32.gmra.mxu1 %v63_v3 }
  0x3e   :  { %212 = vmatmul.f32.gmra.mxu2 %v64_v4 }
  0x3f   :  { %241 = vmatmul.f32.gmra.mxu3 %v65_v5 }
  0x40   :  { %154 = vmatmul.f32.gmra.mxu0 %v64_v4 }
  0x41   :  { %183 = vmatmul.f32.gmra.mxu1 %v65_v5 }
  0x46   :  { %215 = vmatmul.f32.gmra.mxu2 %v66_v6 }
  0x47   :  { %244 = vmatmul.f32.gmra.mxu3 %v67_v7 }
  0x48   :  { %157 = vmatmul.f32.gmra.mxu0 %v66_v6 }
  0x49   :  { %186 = vmatmul.f32.gmra.mxu1 %v67_v7 }
  0xad   :  { %v149_v8 = vpop.f32.mrf.mxu0 }
  0xae   :  { %v178_v9 = vpop.f32.mrf.mxu1 }
  0xaf   :  { %v179_v10 = vadd.f32 %v178_v9, %v149_v8 }
  0xb1   :  { %v207_v11 = vpop.f32.mrf.mxu2  ;;  %284 = vmatpush.msrb.mxu0 %v179_v10 }
  0xb2   :  { %v236_v12 = vpop.f32.mrf.mxu3  ;;  %457 = vmatmul.msk.f32.vlgmr.msrb.gmra.mxu0 %vm265_vm0, %v256_v14 }
  0xb3   :  { %v237_v13 = vadd.f32 %v236_v12, %v207_v11 }
  0xb5   :  { %304 = vmatpush.msrb.mxu1 %v237_v13  ;;  %v152_v15 = vpop.f32.mrf.mxu0 }
  0xb6   :  { %458 = vmatmul.msk.f32.vlgmr.msrb.gmra.mxu1 %vm265_vm0, %v256_v14  ;;  %v181_v16 = vpop.f32.mrf.mxu1 }
  0xb7   :  { %v182_v17 = vadd.f32 %v181_v16, %v152_v15 }
  0xb9   :  { %v210_v18 = vpop.f32.mrf.mxu2  ;;  %324 = vmatpush.msrb.mxu2 %v182_v17 }
  0xba   :  { %v239_v19 = vpop.f32.mrf.mxu3  ;;  %459 = vmatmul.msk.f32.vlgmr.msrb.gmra.mxu2 %vm265_vm0, %v256_v14 }
  0xbb   :  { %v240_v20 = vadd.f32 %v239_v19, %v210_v18 }
  0xbd   :  { %344 = vmatpush.msrb.mxu3 %v240_v20  ;;  %v155_v21 = vpop.f32.mrf.mxu0 }
  0xbe   :  { %460 = vmatmul.msk.f32.vlgmr.msrb.gmra.mxu3 %vm265_vm0, %v256_v14  ;;  %v184_v22 = vpop.f32.mrf.mxu1 }
  0xbf   :  { %v185_v23 = vadd.f32 %v184_v22, %v155_v21 }
  0xc1   :  { %v213_v24 = vpop.f32.mrf.mxu2  ;;  %364 = vmatpush.msra.mxu0 %v185_v23 }
  0xc2   :  { %v242_v25 = vpop.f32.mrf.mxu3  ;;  %461 = vmatmul.msk.f32.vlgmr.msra.gmra.mxu0 %vm265_vm0, %v256_v14 }
  0xc3   :  { %v243_v26 = vadd.f32 %v242_v25, %v213_v24 }
  0xc5   :  { %384 = vmatpush.msra.mxu1 %v243_v26  ;;  %v158_v27 = vpop.f32.mrf.mxu0 }
  0xc6   :  { %462 = vmatmul.msk.f32.vlgmr.msra.gmra.mxu1 %vm265_vm0, %v256_v14  ;;  %v187_v28 = vpop.f32.mrf.mxu1 }
  0xc7   :  { %v188_v29 = vadd.f32 %v187_v28, %v158_v27 }
  0xc9   :  { %v216_v30 = vpop.f32.mrf.mxu2  ;;  %404 = vmatpush.msra.mxu2 %v188_v29 }
  0xca   :  { %v245_v31 = vpop.f32.mrf.mxu3  ;;  %463 = vmatmul.msk.f32.vlgmr.msra.gmra.mxu2 %vm265_vm0, %v256_v14 }
  0xcb   :  { %v246_v32 = vadd.f32 %v245_v31, %v216_v30 }
  0xcd   :  { %424 = vmatpush.msra.mxu3 %v246_v32 }
  0xce   :  { %464 = vmatmul.msk.f32.vlgmr.msra.gmra.mxu3 %vm265_vm0, %v256_v14 }
 0x12f   :  { %v286_v33 = vpop.f32.mrf.mxu0 }
 0x130   :  { %429 = vst [vmem:[#allocation9] sm:$0xff] %v286_v33 }
 0x133   :  { %v306_v34 = vpop.f32.mrf.mxu1 }
 0x134   :  { %430 = vst [vmem:[#allocation9 + $0x8] sm:$0xff] %v306_v34 }
 0x13d   :  { %v326_v35 = vpop.f32.mrf.mxu2 }
 0x13e   :  { %431 = vst [vmem:[#allocation9 + $0x10] sm:$0xff] %v326_v35 }
 0x13f   :  { %v366_v37 = vpop.f32.mrf.mxu0 }
 0x140   :  { %433 = vst [vmem:[#allocation9 + $0x20] sm:$0xff] %v366_v37 }
 0x141   :  { %v346_v36 = vpop.f32.mrf.mxu3 }
 0x142   :  { %432 = vst [vmem:[#allocation9 + $0x18] sm:$0xff] %v346_v36 }
 0x143   :  { %v386_v38 = vpop.f32.mrf.mxu1 }
 0x144   :  { %434 = vst [vmem:[#allocation9 + $0x28] sm:$0xff] %v386_v38 }
 0x14d   :  { %v406_v39 = vpop.f32.mrf.mxu2 }
 0x14e   :  { %435 = vst [vmem:[#allocation9 + $0x30] sm:$0xff] %v406_v39 }
 0x151   :  { %v426_v40 = vpop.f32.mrf.mxu3 }
 0x152   :  { %436 = vst [vmem:[#allocation9 + $0x38] sm:$0xff] %v426_v40 }
 0x153   :  { %449 = dma.vmem_to_hbm [thread:$0]  %s442_s27, 1024, %s444_s30, [#allocation5], %s574_s20, %s574_s20, %s575_s21  }
 0x154   :  { %571 = dma.done.wait [#allocation5], 1024  }
 0x155   :  { %572 = vsyncadd [#allocation5], 4294966272 }
 0x156   :  { %454 = vsyncpa [#allocation4], 1 }
 0x157   :  { %455 = vsyncpa [#allocation7], 1 }
 0x158   :  { %456 = vsyncpa [#allocation5], 1 }

</bundles_post_ra>
